<compile_context>
chip_gen: v7x
topology: tpu7x:2x2x1
jax: 0.10.0
libtpu: 0.0.40
codegen_flags: <defaults>
</compile_context>

<pallas_src>
import functools

import jax
import jax.numpy as jnp
from jax import lax
from jax.experimental import pallas as pl
from jax.experimental.pallas import tpu as pltpu

BN_EPS = 0.8   # nn.BatchNorm1d(hidden_size, 0.8) -> eps = 0.8
LANE = 128


def _vae_kernel(xe_ref, w_ref, pv_ref, out_ref, *, n_in, H, L, n_out):
    # ---- input slab: [x | eps] ----
    xe = xe_ref[...]                      # (B, n_in + L)
    x = xe[:, :n_in]                      # (B, n_in)
    eps = xe[:, n_in:n_in + L]            # (B, L)

    # ---- weight slab slices (static, sublane-tile-aligned row offsets) ----
    r = 0
    w1e = w_ref[r:r + n_in, :]; r += n_in     # (n_in, 128) real cols [0, H)
    wml = w_ref[r:r + H, :];    r += H        # (H, 128)    real cols [0, 2L)
    w1d = w_ref[r:r + L, :];    r += L        # (L, 128)    real cols [0, H)
    w2d = w_ref[r:r + H, :]                   # (H, 128)    real cols [2L, 2L+n_out)

    # ---- parameter slab rows (8 sublanes, lane-0 aligned, zero padded) ----
    b1e = pv_ref[0:1, :]
    g1e = pv_ref[1:2, :]
    be1e = pv_ref[2:3, :]
    bml = pv_ref[3:4, :]                      # [bm | bl] at lanes [0, 2L)
    b1d = pv_ref[4:5, :]
    g1d = pv_ref[5:6, :]
    be1d = pv_ref[6:7, :]
    b2d = pv_ref[7:8, :]                      # b2d at lanes [2L, 2L+n_out)

    def batchnorm(h, g, b):
        mu = jnp.mean(h, axis=0, keepdims=True)
        var = jnp.mean(h * h, axis=0, keepdims=True) - mu * mu    # one-pass biased var
        var = jnp.maximum(var, 0.0)
        return (h - mu) * lax.rsqrt(var + BN_EPS) * g + b

    # ---- Encoder: Linear -> Tanh -> BatchNorm1d ----
    h = jnp.tanh(jnp.dot(x, w1e, preferred_element_type=jnp.float32) + b1e)   # (B, 128)
    h = batchnorm(h, g1e, be1e)                                               # pad lanes stay 0

    # ---- fused mean|logvar projection, lane-placed at [0, 2L) ----
    proj = jnp.dot(h[:, :H], wml, preferred_element_type=jnp.float32) + bml   # (B, 128)

    # ---- Reparameterize: noise = mean + exp(0.5*logvar) * eps ----
    noise = proj[:, :L] + jnp.exp(0.5 * proj[:, L:2 * L]) * eps               # (B, L)

    # ---- Decoder: Linear -> Tanh -> BatchNorm1d -> Linear (lane-placed at [2L, 2L+n_out)) ----
    d = jnp.tanh(jnp.dot(noise, w1d, preferred_element_type=jnp.float32) + b1d)
    d = batchnorm(d, g1d, be1d)
    dec = jnp.dot(d[:, :H], w2d, preferred_element_type=jnp.float32) + b2d    # (B, 128)

    # ---- single unmasked lane-dense store: [mean | logvar | x_tilda | 0-pad] ----
    out_ref[...] = proj + dec                 # disjoint non-zero lanes


def pack_params(p):
    """One-time glue: pack weights into one lane-padded slab and the 8 bias/BN
    vectors into the 8 sublanes of one (8, 128) slab (output lanes pre-placed)."""
    n_in, H = p["w1e"].shape
    L = p["w1d"].shape[0]
    n_out = p["w2d"].shape[1]
    assert H <= LANE and 2 * L + n_out <= LANE, "lane-placement requires narrow dims"

    def lane_pad(w, col_off=0):
        out = jnp.zeros((w.shape[0], LANE), jnp.float32)
        return out.at[:, col_off:col_off + w.shape[1]].set(w)

    wslab = jnp.concatenate([
        lane_pad(p["w1e"]),                                        # rows [0, n_in)
        lane_pad(jnp.concatenate([p["wm"], p["wl"]], axis=1)),     # rows [n_in, n_in+H)
        lane_pad(p["w1d"]),                                        # rows [n_in+H, n_in+H+L)
        lane_pad(p["w2d"], col_off=2 * L),                         # rows [n_in+H+L, n_in+2H+L)
    ], axis=0)                                                     # (n_in+2H+L, 128)

    def row(v, col_off=0):
        return lane_pad(v.reshape(1, -1), col_off)

    pvec = jnp.concatenate([
        row(p["b1e"]), row(p["g1e"]), row(p["be1e"]),
        row(jnp.concatenate([p["bm"], p["bl"]], axis=1)),
        row(p["b1d"]), row(p["g1d"]), row(p["be1d"]),
        row(p["b2d"], col_off=2 * L),
    ], axis=0)                                                     # (8, 128)

    return dict(wslab=wslab, pvec=pvec,
                dims=dict(n_in=int(n_in), H=int(H), L=int(L), n_out=int(n_out)))


def vae_forward(x, eps, pk):
    """x: (B, n_input) f32, eps: (B, latent_dim) f32, pk: packed params.
    Returns (z_mean, z_logvar, x_tilda)."""
    d = pk["dims"]
    n_in, H, L, n_out = d["n_in"], d["H"], d["L"], d["n_out"]
    B = x.shape[0]

    xe = jnp.concatenate([x, eps], axis=1)            # (B, n_in + L): one input DMA

    kernel = functools.partial(_vae_kernel, n_in=n_in, H=H, L=L, n_out=n_out)
    vmem = pl.BlockSpec(memory_space=pltpu.MemorySpace.VMEM)

    flops = int(2 * B * (n_in * H + H * 2 * L + L * H + H * n_out) + 12 * B * (2 * H + L))
    transcendentals = int(B * (2 * H + L))
    bytes_accessed = int(4 * (xe.size + pk["wslab"].size + pk["pvec"].size + B * LANE))

    packed = pl.pallas_call(
        kernel,
        out_shape=jax.ShapeDtypeStruct((B, LANE), jnp.float32),
        in_specs=[vmem, vmem, vmem],
        out_specs=vmem,
        cost_estimate=pl.CostEstimate(
            flops=flops, transcendentals=transcendentals, bytes_accessed=bytes_accessed),
    )(xe, pk["wslab"], pk["pvec"])

    return packed[:, :L], packed[:, L:2 * L], packed[:, 2 * L:2 * L + n_out]


def init_params(key, n_input, n_output, latent_dim, hidden_size):
    """Deterministic synthetic init (PyTorch-like uniform fan-in ranges), unpacked layout."""
    def linear(key, fan_in, fan_out):
        k_w, k_b = jax.random.split(key)
        bound = 1.0 / jnp.sqrt(fan_in)
        w = jax.random.uniform(k_w, (fan_in, fan_out), jnp.float32, -bound, bound)
        b = jax.random.uniform(k_b, (1, fan_out), jnp.float32, -bound, bound)
        return w, b

    keys = jax.random.split(key, 5)
    w1e, b1e = linear(keys[0], n_input, hidden_size)
    wm, bm = linear(keys[1], hidden_size, latent_dim)
    wl, bl = linear(keys[2], hidden_size, latent_dim)
    w1d, b1d = linear(keys[3], latent_dim, hidden_size)
    w2d, b2d = linear(keys[4], hidden_size, n_output)

    ones_h = jnp.ones((1, hidden_size), jnp.float32)
    zeros_h = jnp.zeros((1, hidden_size), jnp.float32)

    return dict(
        w1e=w1e, b1e=b1e, g1e=ones_h, be1e=zeros_h,
        wm=wm, bm=bm, wl=wl, bl=bl,
        w1d=w1d, b1d=b1d, g1d=ones_h, be1d=zeros_h,
        w2d=w2d, b2d=b2d,
    )


def vae_forward_ref(x, eps, p):
    """Pure-JAX reference (unpacked params) for correctness checking."""
    def bn(h):
        mu = jnp.mean(h, axis=0, keepdims=True)
        var = jnp.mean((h - mu) ** 2, axis=0, keepdims=True)
        return (h - mu) / jnp.sqrt(var + BN_EPS)

    h = bn(jnp.tanh(x @ p["w1e"] + p["b1e"])) * p["g1e"] + p["be1e"]
    z_mean = h @ p["wm"] + p["bm"]
    z_logvar = h @ p["wl"] + p["bl"]
    noise = z_mean + jnp.exp(0.5 * z_logvar) * eps
    d = bn(jnp.tanh(noise @ p["w1d"] + p["b1d"])) * p["g1d"] + p["be1d"]
    x_tilda = d @ p["w2d"] + p["b2d"]
    return z_mean, z_logvar, x_tilda


if __name__ == "__main__":
    # Small shapes consistent with VAE(n_input=8, n_output=8, latent_dim=16, hidden_size=32)
    B, n_input, n_output, latent_dim, hidden_size = 8, 8, 8, 16, 32

    key = jax.random.PRNGKey(0)
    k_x, k_eps, k_params = jax.random.split(key, 3)

    x = jax.random.normal(k_x, (B, n_input), jnp.float32)
    eps = jax.random.normal(k_eps, (B, latent_dim), jnp.float32)   # torch.randn(len(x), latent_dim)
    params = init_params(k_params, n_input, n_output, latent_dim, hidden_size)
    packed_params = pack_params(params)

    z_mean, z_logvar, x_tilda = vae_forward(x, eps, packed_params)
    jax.block_until_ready((z_mean, z_logvar, x_tilda))

    # sanity check against pure-JAX reference (unfused / unpacked params)
    zm_ref, zl_ref, xt_ref = vae_forward_ref(x, eps, params)
    assert jnp.allclose(z_mean, zm_ref, atol=1e-4, rtol=1e-4)
    assert jnp.allclose(z_logvar, zl_ref, atol=1e-4, rtol=1e-4)
    assert jnp.allclose(x_tilda, xt_ref, atol=1e-4, rtol=1e-4)

    print("KERNEL_OK")
</pallas_src>

<mosaic_0001>
module attributes {stable_mosaic.version = 11 : i64} {
  func.func @_vae_kernel(%arg0: memref<8x24xf32, #tpu.memory_space<vmem>>, %arg1: memref<88x128xf32, #tpu.memory_space<vmem>>, %arg2: memref<8x128xf32, #tpu.memory_space<vmem>>, %arg3: memref<8x128xf32, #tpu.memory_space<vmem>>) attributes {dimension_semantics = [], scalar_prefetch = 0 : i64, scratch_operands = 0 : i64, tpu.core_type = #tpu.core_type<tc>} {
    %c0 = arith.constant 0 : index
    %c0_0 = arith.constant 0 : index
    %0 = vector.load %arg0[%c0, %c0_0] : memref<8x24xf32, #tpu.memory_space<vmem>>, vector<8x24xf32>
    %1 = vector.extract_strided_slice %0 {offsets = [0, 0], sizes = [8, 8], strides = [1, 1]} : vector<8x24xf32> to vector<8x8xf32>
    %2 = vector.extract_strided_slice %0 {offsets = [0, 8], sizes = [8, 16], strides = [1, 1]} : vector<8x24xf32> to vector<8x16xf32>
    %c0_1 = arith.constant 0 : index
    %c0_2 = arith.constant 0 : index
    %3 = vector.load %arg1[%c0_1, %c0_2] : memref<88x128xf32, #tpu.memory_space<vmem>>, vector<8x128xf32>
    %c8 = arith.constant 8 : index
    %c0_3 = arith.constant 0 : index
    %4 = vector.load %arg1[%c8, %c0_3] : memref<88x128xf32, #tpu.memory_space<vmem>>, vector<32x128xf32>
    %c40 = arith.constant 40 : index
    %c0_4 = arith.constant 0 : index
    %5 = vector.load %arg1[%c40, %c0_4] : memref<88x128xf32, #tpu.memory_space<vmem>>, vector<16x128xf32>
    %c56 = arith.constant 56 : index
    %c0_5 = arith.constant 0 : index
    %6 = vector.load %arg1[%c56, %c0_5] : memref<88x128xf32, #tpu.memory_space<vmem>>, vector<32x128xf32>
    %c0_6 = arith.constant 0 : index
    %c0_7 = arith.constant 0 : index
    %7 = vector.load %arg2[%c0_6, %c0_7] : memref<8x128xf32, #tpu.memory_space<vmem>>, vector<1x128xf32>
    %c1 = arith.constant 1 : index
    %c0_8 = arith.constant 0 : index
    %8 = vector.load %arg2[%c1, %c0_8] : memref<8x128xf32, #tpu.memory_space<vmem>>, vector<1x128xf32>
    %c2 = arith.constant 2 : index
    %c0_9 = arith.constant 0 : index
    %9 = vector.load %arg2[%c2, %c0_9] : memref<8x128xf32, #tpu.memory_space<vmem>>, vector<1x128xf32>
    %c3 = arith.constant 3 : index
    %c0_10 = arith.constant 0 : index
    %10 = vector.load %arg2[%c3, %c0_10] : memref<8x128xf32, #tpu.memory_space<vmem>>, vector<1x128xf32>
    %c4 = arith.constant 4 : index
    %c0_11 = arith.constant 0 : index
    %11 = vector.load %arg2[%c4, %c0_11] : memref<8x128xf32, #tpu.memory_space<vmem>>, vector<1x128xf32>
    %c5 = arith.constant 5 : index
    %c0_12 = arith.constant 0 : index
    %12 = vector.load %arg2[%c5, %c0_12] : memref<8x128xf32, #tpu.memory_space<vmem>>, vector<1x128xf32>
    %c6 = arith.constant 6 : index
    %c0_13 = arith.constant 0 : index
    %13 = vector.load %arg2[%c6, %c0_13] : memref<8x128xf32, #tpu.memory_space<vmem>>, vector<1x128xf32>
    %c7 = arith.constant 7 : index
    %c0_14 = arith.constant 0 : index
    %14 = vector.load %arg2[%c7, %c0_14] : memref<8x128xf32, #tpu.memory_space<vmem>>, vector<1x128xf32>
    %cst = arith.constant dense<0.000000e+00> : vector<8x128xf32>
    %15 = tpu.matmul %1, %3, %cst {dimension_numbers = #tpu.dot_dimension_numbers<[1], [0], [0], [1], [0, 0, 1, 1], [], []>} : vector<8x8xf32>, vector<8x128xf32>, vector<8x128xf32> -> vector<8x128xf32>
    %16 = vector.broadcast %7 : vector<1x128xf32> to vector<8x128xf32>
    %17 = arith.addf %15, %16 : vector<8x128xf32>
    %18 = math.tanh %17 : vector<8x128xf32>
    %cst_15 = arith.constant dense<0.000000e+00> : vector<128xf32>
    %19 = vector.multi_reduction <add>, %18, %cst_15 [0] : vector<8x128xf32> to vector<128xf32>
    %20 = vector.shape_cast %19 : vector<128xf32> to vector<1x128xf32>
    %cst_16 = arith.constant 8.000000e+00 : f32
    %21 = vector.broadcast %cst_16 : f32 to vector<1x128xf32>
    %22 = arith.divf %20, %21 : vector<1x128xf32>
    %23 = arith.mulf %18, %18 : vector<8x128xf32>
    %cst_17 = arith.constant dense<0.000000e+00> : vector<128xf32>
    %24 = vector.multi_reduction <add>, %23, %cst_17 [0] : vector<8x128xf32> to vector<128xf32>
    %25 = vector.shape_cast %24 : vector<128xf32> to vector<1x128xf32>
    %cst_18 = arith.constant 8.000000e+00 : f32
    %26 = vector.broadcast %cst_18 : f32 to vector<1x128xf32>
    %27 = arith.divf %25, %26 : vector<1x128xf32>
    %28 = arith.mulf %22, %22 : vector<1x128xf32>
    %29 = arith.subf %27, %28 : vector<1x128xf32>
    %cst_19 = arith.constant 0.000000e+00 : f32
    %30 = vector.broadcast %cst_19 : f32 to vector<1x128xf32>
    %31 = arith.maximumf %29, %30 : vector<1x128xf32>
    %32 = vector.broadcast %22 : vector<1x128xf32> to vector<8x128xf32>
    %33 = arith.subf %18, %32 : vector<8x128xf32>
    %cst_20 = arith.constant 8.000000e-01 : f32
    %34 = vector.broadcast %cst_20 : f32 to vector<1x128xf32>
    %35 = arith.addf %31, %34 : vector<1x128xf32>
    %36 = math.rsqrt %35 : vector<1x128xf32>
    %37 = vector.broadcast %36 : vector<1x128xf32> to vector<8x128xf32>
    %38 = arith.mulf %33, %37 : vector<8x128xf32>
    %39 = vector.broadcast %8 : vector<1x128xf32> to vector<8x128xf32>
    %40 = arith.mulf %38, %39 : vector<8x128xf32>
    %41 = vector.broadcast %9 : vector<1x128xf32> to vector<8x128xf32>
    %42 = arith.addf %40, %41 : vector<8x128xf32>
    %43 = vector.extract_strided_slice %42 {offsets = [0, 0], sizes = [8, 32], strides = [1, 1]} : vector<8x128xf32> to vector<8x32xf32>
    %cst_21 = arith.constant dense<0.000000e+00> : vector<8x128xf32>
    %44 = tpu.matmul %43, %4, %cst_21 {dimension_numbers = #tpu.dot_dimension_numbers<[1], [0], [0], [1], [0, 0, 1, 1], [], []>} : vector<8x32xf32>, vector<32x128xf32>, vector<8x128xf32> -> vector<8x128xf32>
    %45 = vector.broadcast %10 : vector<1x128xf32> to vector<8x128xf32>
    %46 = arith.addf %44, %45 : vector<8x128xf32>
    %47 = vector.extract_strided_slice %46 {offsets = [0, 0], sizes = [8, 16], strides = [1, 1]} : vector<8x128xf32> to vector<8x16xf32>
    %48 = vector.extract_strided_slice %46 {offsets = [0, 16], sizes = [8, 16], strides = [1, 1]} : vector<8x128xf32> to vector<8x16xf32>
    %cst_22 = arith.constant 5.000000e-01 : f32
    %49 = vector.broadcast %cst_22 : f32 to vector<8x16xf32>
    %50 = arith.mulf %49, %48 : vector<8x16xf32>
    %51 = math.exp %50 : vector<8x16xf32>
    %52 = arith.mulf %51, %2 : vector<8x16xf32>
    %53 = arith.addf %47, %52 : vector<8x16xf32>
    %cst_23 = arith.constant dense<0.000000e+00> : vector<8x128xf32>
    %54 = tpu.matmul %53, %5, %cst_23 {dimension_numbers = #tpu.dot_dimension_numbers<[1], [0], [0], [1], [0, 0, 1, 1], [], []>} : vector<8x16xf32>, vector<16x128xf32>, vector<8x128xf32> -> vector<8x128xf32>
    %55 = vector.broadcast %11 : vector<1x128xf32> to vector<8x128xf32>
    %56 = arith.addf %54, %55 : vector<8x128xf32>
    %57 = math.tanh %56 : vector<8x128xf32>
    %cst_24 = arith.constant dense<0.000000e+00> : vector<128xf32>
    %58 = vector.multi_reduction <add>, %57, %cst_24 [0] : vector<8x128xf32> to vector<128xf32>
    %59 = vector.shape_cast %58 : vector<128xf32> to vector<1x128xf32>
    %cst_25 = arith.constant 8.000000e+00 : f32
    %60 = vector.broadcast %cst_25 : f32 to vector<1x128xf32>
    %61 = arith.divf %59, %60 : vector<1x128xf32>
    %62 = arith.mulf %57, %57 : vector<8x128xf32>
    %cst_26 = arith.constant dense<0.000000e+00> : vector<128xf32>
    %63 = vector.multi_reduction <add>, %62, %cst_26 [0] : vector<8x128xf32> to vector<128xf32>
    %64 = vector.shape_cast %63 : vector<128xf32> to vector<1x128xf32>
    %cst_27 = arith.constant 8.000000e+00 : f32
    %65 = vector.broadcast %cst_27 : f32 to vector<1x128xf32>
    %66 = arith.divf %64, %65 : vector<1x128xf32>
    %67 = arith.mulf %61, %61 : vector<1x128xf32>
    %68 = arith.subf %66, %67 : vector<1x128xf32>
    %cst_28 = arith.constant 0.000000e+00 : f32
    %69 = vector.broadcast %cst_28 : f32 to vector<1x128xf32>
    %70 = arith.maximumf %68, %69 : vector<1x128xf32>
    %71 = vector.broadcast %61 : vector<1x128xf32> to vector<8x128xf32>
    %72 = arith.subf %57, %71 : vector<8x128xf32>
    %cst_29 = arith.constant 8.000000e-01 : f32
    %73 = vector.broadcast %cst_29 : f32 to vector<1x128xf32>
    %74 = arith.addf %70, %73 : vector<1x128xf32>
    %75 = math.rsqrt %74 : vector<1x128xf32>
    %76 = vector.broadcast %75 : vector<1x128xf32> to vector<8x128xf32>
    %77 = arith.mulf %72, %76 : vector<8x128xf32>
    %78 = vector.broadcast %12 : vector<1x128xf32> to vector<8x128xf32>
    %79 = arith.mulf %77, %78 : vector<8x128xf32>
    %80 = vector.broadcast %13 : vector<1x128xf32> to vector<8x128xf32>
    %81 = arith.addf %79, %80 : vector<8x128xf32>
    %82 = vector.extract_strided_slice %81 {offsets = [0, 0], sizes = [8, 32], strides = [1, 1]} : vector<8x128xf32> to vector<8x32xf32>
    %cst_30 = arith.constant dense<0.000000e+00> : vector<8x128xf32>
    %83 = tpu.matmul %82, %6, %cst_30 {dimension_numbers = #tpu.dot_dimension_numbers<[1], [0], [0], [1], [0, 0, 1, 1], [], []>} : vector<8x32xf32>, vector<32x128xf32>, vector<8x128xf32> -> vector<8x128xf32>
    %84 = vector.broadcast %14 : vector<1x128xf32> to vector<8x128xf32>
    %85 = arith.addf %83, %84 : vector<8x128xf32>
    %86 = arith.addf %46, %85 : vector<8x128xf32>
    %c0_31 = arith.constant 0 : index
    %c0_32 = arith.constant 0 : index
    %87 = vector.load %arg3[%c0_31, %c0_32] : memref<8x128xf32, #tpu.memory_space<vmem>>, vector<8x128xf32>
    tpu.vector_store %arg3[%c0_31, %c0_32], %86 {strides = array<i32>} : memref<8x128xf32, #tpu.memory_space<vmem>>, vector<8x128xf32>,
    return
  }
}

</mosaic_0001>

<bundles_post_ra>
// kernel: tpu_custom_call.1
= control target key start
LH: loop header
LB: loop body
LE: loop exit
PB: predicated region body
PF: predicated region fallthrough
CT: control target
= control target key end

     0   :  { %8 = vsyncpa [#allocation3], 0  ;;  %s771_s0 = inlined_call_operand.hbm [shape: f32[8,24], index: 0, kind: input, shape index: {}]   ;;  %s772_s1 = inlined_call_operand.hbm [shape: f32[88,128], index: 1, kind: input, shape index: {}]   ;;  %s773_s2 = inlined_call_operand.hbm [shape: f32[8,128], index: 2, kind: input, shape index: {}]   ;;  %s774_s3 = inlined_call_operand.hbm [shape: f32[8,128], index: 3, kind: output, shape index: {}]  }
   0x1   :  { %9 = vsyncpa [#allocation6], 0 }
   0x2   :  { %10 = vsyncpa [#allocation4], 0  ;;  %s670_s12 = smov [#allocation5]   ;;  %s576_s16 = scalar_lea.hbm %s772_s1, 1408 }
   0x3   :  { %s26_s13 = sshll.u32 %s670_s12, 4  ;;  %p577_p0 = scmp.ne.s32.totalorder %s772_s1, %s576_s16  ;;  %s27_s13 = int_to_ptr.vmem [resolvable:$true] %s26_s13 }
   0x4   :  { %p580_p1 = scmp.lt.u32.totalorder %s576_s16, %s772_s1 }
   0x6   :  { %p582_p2 = pnand %p580_p1, %p577_p0 }
   0x8   :  { %585 = shalt.err (!%p582_p2)
}
   0x9   :  { %s586_s21 = scalar_lea.vmem %s27_s13, 1408  ;;  %p591_p4 = scmp.lt.s32.totalorder %s27_s13, %s27_s13 }
   0xa   :  { %p587_p3 = scmp.ne.s32.totalorder %s27_s13, %s586_s21  ;;  %p592_p5 = scmp.lt.s32.totalorder %s586_s21, %s586_s21 }
   0xc   :  { %p593_p6 = por %p592_p5, %p591_p4 }
   0xe   :  { %p594_p7 = pnand %p593_p6, %p587_p3 }
  0x10   :  { %597 = shalt.err (!%p594_p7)
}
  0x11   :  { %s671_s22 = smov 128   ;;  %s672_s23 = smov 8  }
  0x12   :  { %32 = dma.hbm_to_vmem [thread:$0]  %s772_s1, 1408, %s27_s13, [#allocation6], %s671_s22, %s671_s22, %s672_s23  }
  0x13   :  { %s673_s26 = smov [#allocation2]   ;;  %s674_s28 = smov [#allocation7]  }
  0x14   :  { %s17_s27 = sshll.u32 %s673_s26, 4  ;;  %s39_s29 = sshll.u32 %s674_s28, 4  ;;  %s18_s27 = int_to_ptr.vmem [resolvable:$true] %s17_s27  ;;  %s40_s29 = int_to_ptr.vmem [resolvable:$true] %s39_s29 }
  0x15   :  { %s598_s5 = scalar_lea.hbm %s771_s0, 128 }
  0x16   :  { %p599_p8 = scmp.ne.s32.totalorder %s771_s0, %s598_s5  ;;  %p602_p9 = scmp.lt.u32.totalorder %s598_s5, %s771_s0 }
  0x18   :  { %p604_p10 = pnand %p602_p9, %p599_p8 }
  0x1a   :  { %607 = shalt.err (!%p604_p10)
}
  0x1b   :  { %s608_s1 = scalar_lea.vmem %s18_s27, 128  ;;  %p613_p12 = scmp.lt.s32.totalorder %s18_s27, %s18_s27 }
  0x1c   :  { %p609_p11 = scmp.ne.s32.totalorder %s18_s27, %s608_s1  ;;  %p614_p13 = scmp.lt.s32.totalorder %s608_s1, %s608_s1 }
  0x1e   :  { %p615_p0 = por %p614_p13, %p613_p12 }
  0x20   :  { %p616_p1 = pnand %p615_p0, %p609_p11 }
  0x22   :  { %619 = shalt.err (!%p616_p1)
}
  0x23   :  { %20 = dma.hbm_to_vmem [thread:$0]  %s771_s0, 128, %s18_s27, [#allocation3]  }
  0x24   :  { %s620_s14 = scalar_lea.hbm %s773_s2, 128 }
  0x25   :  { %p621_p2 = scmp.ne.s32.totalorder %s773_s2, %s620_s14  ;;  %p624_p3 = scmp.lt.u32.totalorder %s620_s14, %s773_s2 }
  0x27   :  { %p626_p4 = pnand %p624_p3, %p621_p2 }
  0x29   :  { %629 = shalt.err (!%p626_p4)
}
  0x2a   :  { %s630_s19 = scalar_lea.vmem %s40_s29, 128  ;;  %p635_p6 = scmp.lt.s32.totalorder %s40_s29, %s40_s29 }
  0x2b   :  { %p631_p5 = scmp.ne.s32.totalorder %s40_s29, %s630_s19  ;;  %p636_p7 = scmp.lt.s32.totalorder %s630_s19, %s630_s19 }
  0x2d   :  { %p637_p8 = por %p636_p7, %p635_p6 }
  0x2f   :  { %p638_p9 = pnand %p637_p8, %p631_p5 }
  0x31   :  { %641 = shalt.err (!%p638_p9)
}
  0x32   :  { %42 = dma.hbm_to_vmem [thread:$0]  %s773_s2, 128, %s40_s29, [#allocation6]  }
  0x33   :  { %664 = dma.done.wait [#allocation3], 128  }
  0x34   :  { %665 = vsyncadd [#allocation3], 4294967168 }
  0x35   :  { %666 = dma.done.wait [#allocation6], 1536  }
  0x36   :  { %667 = vsyncadd [#allocation6], 4294965760  ;;  %v675_v0 = vmov 0.0   ;;  %vm676_vm0 = vmmov 0   ;;  %vm76_vm1 = vcmask 64512   ;;  %v53_v1 = vld [vmem:[#allocation5] sm:$0xff] }
  0x37   :  { %507 = vmatprep.subr.mxu1 %v675_v0  ;;  %509 = vmatprep.mubr.msk.f32.mxu1 %vm676_vm0, %v675_v0  ;;  %v52_v2 = vld [vmem:[#allocation2] sm:$0xff]  ;;  %v54_v3 = vld [vmem:[#allocation5 + $0x8] sm:$0xff]  ;;  %v55_v4 = vld [vmem:[#allocation5 + $0x10] sm:$0xff]  ;;  %v677_v6 = vmov 0.0|0.0   ;;  %vm188_vm2 = vcmask 261120   ;;  %s678_s2 = smov 112  }
  0x38   :  { %527 = vmatprep.mubr.msk.f32.mxu0 %vm676_vm0, %v675_v0  ;;  %508 = vmatpush3.msra.mxu1 %v53_v1  ;;  %v56_v5 = vld [vmem:[#allocation5 + $0x18] sm:$0xff]  ;;  %v542_v7 = vpack.c.bf16 %v55_v4, %v54_v3  ;;  %v57_v8 = vld [vmem:[#allocation5 + $0x20] sm:$0xff]  ;;  %v58_v41 = vld [vmem:[#allocation5 + $0x28] sm:$0xff]  ;;  %vm278_vm3 = vcmask 130048   ;;  %s679_s21 = smov [#allocation8]  }
  0x39   :  { %265 = vrot.lane.b32.xlu0 %v52_v2, %s672_s23  ;;  %510 = vmatmul.mubr.msk.f32.vlgmr.msra.gmra.mrb[0].mxu1 %vm76_vm1, %v52_v2  ;;  %v545_v9 = vpack.c.bf16 %v57_v8, %v56_v5  ;;  %v480_v10 = vld [vmem:[#allocation7] ss:$0 sm:$0xff]  ;;  %v482_v36 = vld [vmem:[#allocation7 + $0x1] ss:$0 sm:$0xff]  ;;  %v483_v38 = vld [vmem:[#allocation7 + $0x2] ss:$0 sm:$0xff] }
  0x3a   :  { %520 = vmatprep.mubr.msk.f32.mxu1 %vm676_vm0, %v675_v0  ;;  %541 = vmatprep.subr.bf16.mxu1 %v677_v6  ;;  %v59_v42 = vld [vmem:[#allocation5 + $0x30] sm:$0xff]  ;;  %v484_v44 = vld [vmem:[#allocation7 + $0x3] ss:$0 sm:$0xff]  ;;  %v61_v56 = vld [vmem:[#allocation5 + $0x40] sm:$0xff]  ;;  %s470_s22 = sshll.u32 %s679_s21, 4  ;;  %s471_s22 = int_to_ptr.vmem [resolvable:$true] %s470_s22 }
  0x3b   :  { %547 = vmatprep.subr.bf16.mxu0 %v677_v6  ;;  %543 = vmatpush3.bf16.msra.mxu1 %v542_v7  ;;  %v548_v43 = vpack.c.bf16 %v59_v42, %v58_v41  ;;  %v60_v55 = vld [vmem:[#allocation5 + $0x38] sm:$0xff]  ;;  %v62_v57 = vld [vmem:[#allocation5 + $0x48] sm:$0xff]  ;;  %v63_v59 = vld [vmem:[#allocation5 + $0x50] sm:$0xff]  ;;  %s642_s23 = scalar_lea.vmem %s471_s22, 128  ;;  %p647_p11 = scmp.lt.s32.totalorder %s471_s22, %s471_s22 }
  0x3c   :  { %544 = vmatprep.subr.bf16.mxu1 %v677_v6  ;;  %v551_v58 = vpack.c.bf16 %v61_v56, %v60_v55  ;;  %v554_v60 = vpack.c.bf16 %v63_v59, %v62_v57  ;;  %v486_v61 = vld [vmem:[#allocation7 + $0x4] ss:$0 sm:$0xff]  ;;  %p643_p10 = scmp.ne.s32.totalorder %s471_s22, %s642_s23  ;;  %p648_p12 = scmp.lt.s32.totalorder %s642_s23, %s642_s23 }
  0x3d   :  { %549 = vmatpush3.bf16.msra.mxu0 %v548_v43 }
  0x3e   :  { %550 = vmatprep.subr.bf16.mxu0 %v677_v6  ;;  %p649_p13 = por %p648_p12, %p647_p11 }
  0x3f   :  { %546 = vmatpush3.bf16.msra.mxu1 %v545_v9 }
  0x40   :  { %p650_p0 = pnand %p649_p13, %p643_p10 }
  0xab   :  { %v266_v50 = vpop.permute.xlu0 %265 }
 0x10c   :  { %v146_v11 = vpop.f32.mrb[0].mxu1 }
 0x10d   :  { %v147_v12 = vadd.f32 %v480_v10, %v146_v11  ;;  %v511_v13 = vpop.f32.mrb[1].mxu1 }
 0x10f   :  { %566 = vtanh.f32 %v147_v12 }
 0x119   :  { %v567_v14 = vpop.eup %566 }
 0x11a   :  { %v151_v15 = vrot.slane %v567_v14, 4  ;;  %v159_v16 = vmul.f32 %v567_v14, %v567_v14 }
 0x11c   :  { %v152_v17 = vadd.f32 %v567_v14, %v151_v15  ;;  %v160_v18 = vrot.slane %v159_v16, 4 }
 0x11e   :  { %v153_v19 = vrot.slane %v152_v17, 2  ;;  %v161_v20 = vadd.f32 %v160_v18, %v159_v16 }
 0x120   :  { %v154_v21 = vadd.f32 %v153_v19, %v152_v17  ;;  %v162_v22 = vrot.slane %v161_v20, 2 }
 0x122   :  { %v155_v23 = vrot.slane %v154_v21, 1  ;;  %v163_v24 = vadd.f32 %v162_v22, %v161_v20 }
 0x124   :  { %v156_v25 = vadd.f32 %v155_v23, %v154_v21  ;;  %v164_v26 = vrot.slane %v163_v24, 1  ;;  %v488_v23 = vld [vmem:[#allocation7 + $0x5] ss:$0 sm:$0xff] }
 0x126   :  { %v158_v27 = vmul.f32 0.125, %v156_v25  ;;  %v165_v28 = vadd.f32 %v164_v26, %v163_v24  ;;  %v489_v25 = vld [vmem:[#allocation7 + $0x6] ss:$0 sm:$0xff] }
 0x128   :  { %v166_v29 = vmul.f32 0.125, %v165_v28  ;;  %v167_v30 = vmul.f32 %v158_v27, %v158_v27  ;;  %v170_v34 = vsub.f32 %v567_v14, %v158_v27  ;;  %v490_v28 = vld [vmem:[#allocation7 + $0x7] ss:$0 sm:$0xff] }
 0x12a   :  { %v168_v31 = vsub.f32 %v166_v29, %v167_v30 }
 0x12c   :  { %v169_v32 = vmax.f32 %v168_v31, 0.0 }
 0x12e   :  { %v171_v33 = vadd.f32 0.8, %v169_v32 }
 0x130   :  { %568 = vrsqrt.f32 %v171_v33 }
 0x13a   :  { %v569_v35 = vpop.eup %568 }
 0x13b   :  { %v173_v37 = vmul.f32 %v569_v35, %v170_v34 }
 0x13d   :  { %v178_v39 = vmul.f32 %v482_v36, %v173_v37 }
 0x13f   :  { %v183_v40 = vadd.f32 %v483_v38, %v178_v39 }
 0x141   :  { %521 = vmatmul.mubr.msk.f32.vlgmr.msra.gmra.mrb[2].mxu1 %vm188_vm2, %v183_v40 }
 0x214   :  { %v258_v45 = vpop.f32.mrb[2].mxu1 }
 0x215   :  { %v750_v46 = vadd.f32 %v484_v44, %v258_v45  ;;  %v522_v47 = vpop.f32.mrb[3].mxu1 }
 0x217   :  { %v262_v48 = vmul.f32 0.5, %v750_v46 }
 0x219   :  { %v263_v49 = vmul.f32 1.442695, %v262_v48 }
 0x21b   :  { %570 = vpow2.f32 %v263_v49 }
 0x225   :  { %v571_v51 = vpop.eup %570 }
 0x226   :  { %v268_v52 = vmul.f32 %v571_v51, %v266_v50 }
 0x228   :  { %270 = vrot.lane.b32.xlu0 %v268_v52, %s678_s2 }
 0x29a   :  { %v271_v53 = vpop.permute.xlu0 %270 }
 0x29b   :  { %v273_v54 = vadd.f32 %v271_v53, %v750_v46 }
 0x29d   :  { %528 = vmatmul.mubr.msk.f32.vlgmr.msra.gmra.mrb[0].mxu0 %vm278_vm3, %v273_v54 }
 0x29e   :  { %538 = vmatprep.mubr.msk.f32.mxu0 %vm676_vm0, %v675_v0  ;;  %552 = vmatpush3.bf16.msra.mxu0 %v551_v58 }
 0x29f   :  { %553 = vmatprep.subr.bf16.mxu0 %v677_v6 }
 0x2a2   :  { %555 = vmatpush3.bf16.msra.mxu0 %v554_v60 }
 0x370   :  { %v348_v62 = vpop.f32.mrb[0].mxu0 }
 0x371   :  { %v349_v63 = vadd.f32 %v486_v61, %v348_v62  ;;  %v529_v1 = vpop.f32.mrb[1].mxu0 }
 0x373   :  { %572 = vtanh.f32 %v349_v63 }
 0x37d   :  { %v573_v2 = vpop.eup %572 }
 0x37e   :  { %v353_v3 = vrot.slane %v573_v2, 4  ;;  %v360_v4 = vmul.f32 %v573_v2, %v573_v2 }
 0x380   :  { %v354_v5 = vadd.f32 %v573_v2, %v353_v3  ;;  %v361_v0 = vrot.slane %v360_v4, 4 }
 0x382   :  { %v355_v7 = vrot.slane %v354_v5, 2  ;;  %v362_v8 = vadd.f32 %v361_v0, %v360_v4 }
 0x384   :  { %v356_v9 = vadd.f32 %v355_v7, %v354_v5  ;;  %v363_v10 = vrot.slane %v362_v8, 2 }
 0x386   :  { %v357_v11 = vrot.slane %v356_v9, 1  ;;  %v364_v12 = vadd.f32 %v363_v10, %v362_v8 }
 0x388   :  { %v358_v13 = vadd.f32 %v357_v11, %v356_v9  ;;  %v365_v14 = vrot.slane %v364_v12, 1 }
 0x38a   :  { %v359_v6 = vmul.f32 0.125, %v358_v13  ;;  %v366_v15 = vadd.f32 %v365_v14, %v364_v12 }
 0x38c   :  { %v367_v16 = vmul.f32 0.125, %v366_v15  ;;  %v368_v17 = vmul.f32 %v359_v6, %v359_v6  ;;  %v371_v21 = vsub.f32 %v573_v2, %v359_v6 }
 0x38e   :  { %v369_v18 = vsub.f32 %v367_v16, %v368_v17 }
 0x390   :  { %v370_v19 = vmax.f32 %v369_v18, 0.0 }
 0x392   :  { %v372_v20 = vadd.f32 0.8, %v370_v19 }
 0x394   :  { %574 = vrsqrt.f32 %v372_v20 }
 0x39e   :  { %v575_v22 = vpop.eup %574 }
 0x39f   :  { %v374_v24 = vmul.f32 %v575_v22, %v371_v21 }
 0x3a1   :  { %v379_v26 = vmul.f32 %v488_v23, %v374_v24 }
 0x3a3   :  { %v384_v27 = vadd.f32 %v489_v25, %v379_v26 }
 0x3a5   :  { %539 = vmatmul.mubr.msk.f32.vlgmr.msra.gmra.mrb[2].mxu0 %vm188_vm2, %v384_v27 }
 0x478   :  { %v458_v29 = vpop.f32.mrb[2].mxu0 }
 0x479   :  { %v459_v30 = vadd.f32 %v490_v28, %v458_v29  ;;  %v540_v31 = vpop.f32.mrb[3].mxu0 }
 0x47b   :  { %v462_v32 = vadd.f32 %v459_v30, %v750_v46 }
 0x47d   :  { %463 = vst [vmem:[#allocation8] sm:$0xff] %v462_v32 }
 0x47e   :  { %653 = shalt.err (!%p650_p0)
}
 0x47f   :  { %s654_s26 = scalar_lea.hbm %s774_s3, 128 }
 0x480   :  { %p655_p1 = scmp.ne.s32.totalorder %s774_s3, %s654_s26  ;;  %p658_p2 = scmp.lt.u32.totalorder %s654_s26, %s774_s3 }
 0x482   :  { %p660_p3 = pnand %p658_p2, %p655_p1 }
 0x484   :  { %663 = shalt.err (!%p660_p3)
}
 0x485   :  { %473 = dma.vmem_to_hbm [thread:$0]  %s471_s22, 128, %s774_s3, [#allocation4]  }
 0x486   :  { %668 = dma.done.wait [#allocation4], 128  }
 0x487   :  { %669 = vsyncadd [#allocation4], 4294967168 }
 0x488   :  { %477 = vsyncpa [#allocation3], 1 }
 0x489   :  { %478 = vsyncpa [#allocation6], 1 }
 0x48a   :  { %479 = vsyncpa [#allocation4], 1 }

</bundles_post_ra>
